<compile_context>
chip_gen: v5e
topology: v5e:2x2
jax: 0.10.0
libtpu: 0.0.40
codegen_flags: <defaults>
</compile_context>

<pallas_src>
import functools
import math

import jax
import jax.numpy as jnp
from jax.experimental import pallas as pl
from jax.experimental.pallas import tpu as pltpu


def _round_up(x, m):
    return (x + m - 1) // m * m


def _vmem_capacity_bytes():
    try:
        return int(pltpu.get_tpu_info().vmem_capacity_bytes)
    except Exception:
        return 64 << 20  # conservative fallback (v7x per-TensorCore VMEM)


def _embeddings_kernel(ids_ref, emb_ref, pe_ref, out_ref, *, scale, seq_len):
    # ids_ref: (B*S,) int32 token ids, scalar-prefetched into SMEM.
    # emb_ref: (V, D)   VMEM-resident embedding table (constant block index -> DMA'd once).
    # pe_ref:  (TS, D)  positional-encoding rows for this chunk (delivered by BlockSpec).
    # out_ref: (TS, D)  output block (batch dim squeezed), lane/sublane dense.
    b = pl.program_id(0)
    sc = pl.program_id(1)
    ts = out_ref.shape[0]
    v = emb_ref.shape[0]

    base = b * seq_len + sc * ts
    # Rows past the sequence end (ragged last chunk) are skipped: keeps the SMEM id reads
    # and the table loads in bounds; Pallas masks the writeback of those rows.
    n_valid = jnp.minimum(ts, seq_len - sc * ts)

    def gather_row(t, carry):
        tok = ids_ref[base + t]                 # cheap SMEM scalar read
        tok = jnp.clip(tok, 0, v - 1)           # guard: no HW bounds check on VMEM loads
        row = emb_ref[pl.ds(tok, 1), :]         # (1, D) dynamic-slice row load
        out_ref[pl.ds(t, 1), :] = (row.astype(jnp.float32) * scale).astype(out_ref.dtype)
        return carry

    jax.lax.fori_loop(0, n_valid, gather_row, 0)

    # Positional encoding: plain dense VPU add of the BlockSpec-delivered block.
    out_ref[...] += pe_ref[...]


def embeddings_forward(token_ids, emb_table, pe_table, *, chunk_tokens=1024):
    """token_ids: (B, S) int32; emb_table: (V, D); pe_table: (max_len, D)."""
    B, S = token_ids.shape
    V, D = emb_table.shape
    max_len = pe_table.shape[0]
    assert S <= max_len, "sequence length exceeds positional-encoding table"

    out_dtype = emb_table.dtype
    itemsize = jnp.dtype(out_dtype).itemsize
    sublane = max(8, 32 // itemsize)            # 8 for f32, 16 for bf16, 32 for int8

    # Tokens per grid step along the sequence axis (sublane-aligned, <= chunk_tokens).
    TS = _round_up(min(chunk_tokens, _round_up(S, sublane)), sublane)
    num_chunks = pl.cdiv(S, TS)

    scale = math.sqrt(D)

    flat_ids = token_ids.reshape(B * S).astype(jnp.int32)   # SMEM scalar-prefetch operand
    pe = pe_table.astype(out_dtype)

    # --- VMEM budget (per TensorCore; Pallas double-buffers every BlockSpec operand,
    #     including the constant-index resident table which is only DMA'd once) ---
    resident_bytes = V * D * itemsize
    stream_bytes = TS * D * itemsize                         # pe block / out block
    needed = 2 * resident_bytes + 2 * 2 * stream_bytes + (2 << 20)
    usable = _vmem_capacity_bytes() - (16 << 20)             # headroom for Mosaic internals
    assert needed <= usable, (
        "embedding table too large for the VMEM-resident path on this chip; "
        "use the HBM (pl.ANY) + per-row DMA gather path (see TODO above)")
    vmem_limit = int(min(max(needed, 32 << 20), usable))

    kernel = functools.partial(_embeddings_kernel, scale=scale, seq_len=S)

    grid_spec = pltpu.PrefetchScalarGridSpec(
        num_scalar_prefetch=1,
        grid=(B, num_chunks),
        in_specs=[
            # Whole embedding table, VMEM-resident (constant block index).
            pl.BlockSpec((V, D), lambda b, sc, ids: (0, 0)),
            # Contiguous PE rows for this chunk -- no gather needed.
            pl.BlockSpec((TS, D), lambda b, sc, ids: (sc, 0)),
        ],
        # Output written directly as (B, S, D); batch dim squeezed out of the block.
        out_specs=pl.BlockSpec((None, TS, D), lambda b, sc, ids: (b, sc, 0)),
    )

    return pl.pallas_call(
        kernel,
        out_shape=jax.ShapeDtypeStruct((B, S, D), out_dtype),
        grid_spec=grid_spec,
        compiler_params=pltpu.CompilerParams(
            dimension_semantics=("parallel", "parallel"),
            vmem_limit_bytes=vmem_limit,
        ),
    )(flat_ids, emb_table, pe)


def make_positional_encoding(max_len, d_model, dtype=jnp.float32):
    position = jnp.arange(0, max_len, dtype=jnp.float32)[:, None]          # (L, 1)
    div_term = jnp.exp(
        jnp.arange(0, d_model, 2, dtype=jnp.float32) * -(math.log(10000.0) / d_model)
    )                                                                       # (D/2,)
    pe = jnp.zeros((max_len, d_model), dtype=jnp.float32)
    pe = pe.at[:, 0::2].set(jnp.sin(position * div_term))
    pe = pe.at[:, 1::2].set(jnp.cos(position * div_term))
    return pe.astype(dtype)


if __name__ == "__main__":
    # Small, deterministic shapes consistent with the module's forward.
    vocab_size = 64
    d_model = 128
    batch, seq = 2, 8
    max_len = 32

    key = jax.random.PRNGKey(0)
    k_emb, k_ids = jax.random.split(key)

    # nn.Embedding weight ~ N(0, 1) -- deterministic synthetic init.
    emb_table = jax.random.normal(k_emb, (vocab_size, d_model), dtype=jnp.float32)
    token_ids = jax.random.randint(k_ids, (batch, seq), 0, vocab_size, dtype=jnp.int32)
    pe_table = make_positional_encoding(max_len, d_model)

    # TODO(synk): nn.Dropout is identity in eval mode; training-mode stochastic dropout
    # (pltpu.prng_seed / prng_random_bits) is intentionally omitted here.
    out = embeddings_forward(token_ids, emb_table, pe_table)
    out = jax.block_until_ready(out)

    # Pure-JAX reference check.
    ref = emb_table[token_ids] * math.sqrt(d_model) + pe_table[None, :seq]
    assert out.shape == (batch, seq, d_model)
    assert jnp.allclose(out, ref, atol=1e-5, rtol=1e-5)

    print("KERNEL_OK")
</pallas_src>

<mosaic_0001>
module attributes {stable_mosaic.version = 11 : i64} {
  func.func @_embeddings_kernel(%arg0: i32, %arg1: i32, %arg2: memref<16xi32, #tpu.memory_space<smem>>, %arg3: memref<64x128xf32, #tpu.memory_space<vmem>>, %arg4: memref<8x128xf32, #tpu.memory_space<vmem>>, %arg5: memref<1x8x128xf32, #tpu.memory_space<vmem>>) attributes {dimension_semantics = [#tpu.dimension_semantics<parallel>, #tpu.dimension_semantics<parallel>], iteration_bounds = array<i64: 2, 1>, scalar_prefetch = 1 : i64, scratch_operands = 0 : i64, tpu.core_type = #tpu.core_type<tc>, window_params = [{pipeline_mode = #tpu.pipeline_mode<synchronous>, transform_indices = @transform_0, window_bounds = array<i64: 64, 128>}, {transform_indices = @transform_1, window_bounds = array<i64: 8, 128>}, {transform_indices = @transform_2, window_bounds = array<i64: 1, 8, 128>}]} {
    %c8_i32 = arith.constant 8 : i32
    %0 = arith.muli %arg0, %c8_i32 : i32
    %c8_i32_0 = arith.constant 8 : i32
    %1 = arith.muli %arg1, %c8_i32_0 : i32
    %2 = arith.addi %0, %1 : i32
    %c8_i32_1 = arith.constant 8 : i32
    %3 = arith.muli %arg1, %c8_i32_1 : i32
    %c8_i32_2 = arith.constant 8 : i32
    %4 = arith.subi %c8_i32_2, %3 : i32
    %c8_i32_3 = arith.constant 8 : i32
    %5 = arith.minsi %c8_i32_3, %4 : i32
    %c0_i32 = arith.constant 0 : i32
    %c0_i32_4 = arith.constant 0 : i32
    %6 = arith.subi %5, %c0_i32_4 : i32
    %7 = arith.addi %c0_i32_4, %6 : i32
    %c1_i32 = arith.constant 1 : i32
    scf.for %arg6 = %c0_i32_4 to %7 step %c1_i32  : i32 {
      %15 = arith.addi %2, %arg6 : i32
      %16 = arith.index_cast %15 : i32 to index
      %17 = memref.load %arg2[%16] : memref<16xi32, #tpu.memory_space<smem>>
      %c0_i32_12 = arith.constant 0 : i32
      %c63_i32 = arith.constant 63 : i32
      %18 = arith.maxsi %c0_i32_12, %17 : i32
      %19 = arith.minsi %c63_i32, %18 : i32
      %20 = arith.index_cast %19 : i32 to index
      %c0_13 = arith.constant 0 : index
      %21 = vector.load %arg3[%20, %c0_13] : memref<64x128xf32, #tpu.memory_space<vmem>>, vector<1x128xf32>
      %cst = arith.constant 11.3137083 : f32
      %22 = vector.broadcast %cst : f32 to vector<1x128xf32>
      %23 = arith.mulf %21, %22 : vector<1x128xf32>
      %c0_14 = arith.constant 0 : index
      %24 = arith.index_cast %arg6 : i32 to index
      %c0_15 = arith.constant 0 : index
      %25 = vector.load %arg5[%c0_14, %24, %c0_15] : memref<1x8x128xf32, #tpu.memory_space<vmem>>, vector<1x1x128xf32>
      %26 = vector.shape_cast %25 : vector<1x1x128xf32> to vector<1x128xf32>
      %27 = vector.shape_cast %23 : vector<1x128xf32> to vector<1x1x128xf32>
      tpu.vector_store %arg5[%c0_14, %24, %c0_15], %27 {strides = array<i32>} : memref<1x8x128xf32, #tpu.memory_space<vmem>>, vector<1x1x128xf32>,
    }
    %c0 = arith.constant 0 : index
    %c0_5 = arith.constant 0 : index
    %c0_6 = arith.constant 0 : index
    %8 = vector.load %arg5[%c0, %c0_5, %c0_6] : memref<1x8x128xf32, #tpu.memory_space<vmem>>, vector<1x8x128xf32>
    %9 = vector.shape_cast %8 : vector<1x8x128xf32> to vector<8x128xf32>
    %c0_7 = arith.constant 0 : index
    %c0_8 = arith.constant 0 : index
    %10 = vector.load %arg4[%c0_7, %c0_8] : memref<8x128xf32, #tpu.memory_space<vmem>>, vector<8x128xf32>
    %11 = arith.addf %9, %10 : vector<8x128xf32>
    %c0_9 = arith.constant 0 : index
    %c0_10 = arith.constant 0 : index
    %c0_11 = arith.constant 0 : index
    %12 = vector.load %arg5[%c0_9, %c0_10, %c0_11] : memref<1x8x128xf32, #tpu.memory_space<vmem>>, vector<1x8x128xf32>
    %13 = vector.shape_cast %12 : vector<1x8x128xf32> to vector<8x128xf32>
    %14 = vector.shape_cast %11 : vector<8x128xf32> to vector<1x8x128xf32>
    tpu.vector_store %arg5[%c0_9, %c0_10, %c0_11], %14 {strides = array<i32>} : memref<1x8x128xf32, #tpu.memory_space<vmem>>, vector<1x8x128xf32>,
    return
  }
  func.func @transform_0(%arg0: i32, %arg1: i32, %arg2: memref<16xi32, #tpu.memory_space<smem>>) -> (i32, i32) {
    %c0_i32 = arith.constant 0 : i32
    %c0_i32_0 = arith.constant 0 : i32
    %c0_i32_1 = arith.constant 0 : i32
    return %c0_i32, %c0_i32_0 : i32, i32
  }
  func.func @transform_1(%arg0: i32, %arg1: i32, %arg2: memref<16xi32, #tpu.memory_space<smem>>) -> (i32, i32) {
    %c0_i32 = arith.constant 0 : i32
    %c0_i32_0 = arith.constant 0 : i32
    return %arg1, %c0_i32 : i32, i32
  }
  func.func @transform_2(%arg0: i32, %arg1: i32, %arg2: memref<16xi32, #tpu.memory_space<smem>>) -> (i32, i32, i32) {
    %c0_i32 = arith.constant 0 : i32
    %c0_i32_0 = arith.constant 0 : i32
    return %arg0, %arg1, %c0_i32 : i32, i32, i32
  }
}

</mosaic_0001>

<bundles_post_ra>
// kernel: tpu_custom_call.1
= control target key start
LH: loop header
LB: loop body
LE: loop exit
PB: predicated region body
PF: predicated region fallthrough
CT: control target
= control target key end

     0   :  { %s593_s15 = smov [#allocation3]   ;;  %s745_s0 = inlined_call_operand.hbm [shape: s32[16], index: 0, kind: input, shape index: {}]   ;;  %s746_s1 = inlined_call_operand.hbm [shape: f32[64,128], index: 1, kind: input, shape index: {}]   ;;  %s747_s2 = inlined_call_operand.hbm [shape: f32[32,128], index: 2, kind: input, shape index: {}]   ;;  %s748_s3 = inlined_call_operand.hbm [shape: f32[2,8,128], index: 3, kind: output, shape index: {}]  }
   0x1   :  { %s9_s14 = sshll.u32 %s745_s0, 4  ;;  %s10_s14 = int_to_ptr.hbm [resolvable:$true] %s9_s14 }
   0x2   :  { %12 = dma.hbm_to_smem %s10_s14, 16, %s593_s15, [#allocation2] }
   0x3   :  { %551 = dma.done.wait [#allocation2], 16 }
   0x4   :  { %552 = vsyncadd [#allocation2], 4294967280 }
   0x5   :  { %15 = sfence }
   0x6   :  { %16 = vsyncpa [#allocation5], 0 }
   0x7   :  { %17 = vsyncpa [#allocation8], 0 }
   0x8   :  { %18 = vsyncpa [#allocation6], 0 }
   0x9   :  { %20 = vsyncpa [#allocation6 + $0x1], 0  ;;  %s621_s16 = smov 0   ;;  %s623_s17 = smov 0  }
   0xa   :  { %s625_s18 = smov 0   ;;  %s627_s19 = smov 0  }
   0xb   :  { %s629_s20 = smov 0   ;;  %s631_s0 = smov 0  }
   0xc LB: > { %s315_s21 = sadd.s32 4294967295, %s587_s0   ;;  %s316_s22 = sadd.s32 4294967294, %s587_s0   ;;  %s587_s0 = sphi %s631_s0, %s26_s0   ;;  %s583_s20 = sphi %s629_s20, %s757_s20   ;;  %s579_s19 = sphi %s627_s19, %s756_s19   ;;  %s575_s18 = sphi %s625_s18, %s755_s18   ;;  %s571_s17 = sphi %s623_s17, %s754_s17   ;;  %s567_s16 = sphi %s621_s16, %s753_s16  }
   0xd   : > { %s38_s23 = sadd.s32 1, %s583_s20  ;;  %s94_s24 = sadd.s32 1, %s575_s18 }
   0xe   : > { %p40_p0 = scmp.ge.s32.totalorder %s38_s23, 2  ;;  %p104_p1 = scmp.ne.s32.totalorder %s575_s18, %s571_s17 }
   0xf   : > { %p105_p2 = scmp.eq.s32.totalorder %s315_s21, 1  ;;  %p110_p3 = scmp.ne.s32.totalorder %s571_s17, %s567_s16 }
  0x10   : > { %s759_s23 = smov (%p40_p0, %s38_s23), 0  ;;  %p111_p5 = scmp.eq.s32.totalorder %s316_s22, 1 }
  0x11   : > { %p661_p4 = por %p105_p2, %p104_p1  ;;  %s89_s26 = ssub.s32 %s583_s20, %s759_s23 }
  0x12   : > { %p317_p6 = scmp.ge.s32.totalorder %s587_s0, 1  ;;  %p92_p7 = scmp.eq.s32.totalorder %s89_s26, 0 }
  0x13   : > { %p668_p8 = por %p111_p5, %p110_p3  ;;  %p118_p9 = scmp.lt.s32.totalorder %s587_s0, 3 }
  0x14   : > { %s674_s28 = scalar_select %p92_p7, %s575_s18, %s94_s24  }
  0x15   : > { %p676_p10 = pnand %p317_p6, %p118_p9  ;;  %p680_p11 = scmp.eq.s32.totalorder %s315_s21, 0 }
  0x16   : > { %s129_s6 = sshll.u32 %s746_s1, 4  ;;  %s594_s7 = smov [#allocation4]   ;;  %s130_s6 = int_to_ptr.hbm [resolvable:$true] %s129_s6 }
  0x17   : > { %p346_p12 = pneg %p676_p10  ;;  %s131_s8 = sshll.u32 %s594_s7, 4  ;;  %s132_s8 = int_to_ptr.vmem [resolvable:$true] %s131_s8 }
  0x18   : > { %s146_s11 = sshll.u32 %s747_s2, 4  ;;  %s595_s12 = smov 128   ;;  %s147_s11 = int_to_ptr.hbm [resolvable:$true] %s146_s11 }
  0x19   : > { %p347_p13 = pnand %p680_p11, %p346_p12  ;;  %s596_s13 = smov 8  }
  0x1a   : > { %s597_s14 = smov [#allocation7]   ;;  %161 = sbr.rel (%p676_p10) target bundleno = 65 (0x41), region = 28 }
  0x1b   : > { %349 = dma.hbm_to_vmem [thread:$0]  (!%p347_p13), %s130_s6, 1024, %s132_s8, [#allocation5], %s595_s12, %s595_s12, %s596_s13  }
  0x1c   : > { %s148_s15 = sshll.u32 %s597_s14, 4  ;;  %s149_s15 = int_to_ptr.vmem [resolvable:$true] %s148_s15 }
  0x1d   : > { %352 = dma.hbm_to_vmem [thread:$0]  (!%p347_p13), %s147_s11, 128, %s149_s15, [#allocation8]  }
  0x1f   : > { %554 = dma.done.wait (%p680_p11), [#allocation5], 1024  }
  0x20   : > { %556 = vsyncadd (%p680_p11), [#allocation5], 4294966272 }
  0x21   : > { %558 = dma.done.wait (%p680_p11), [#allocation8], 128  }
  0x22   : > { %560 = vsyncadd (%p680_p11), [#allocation8], 4294967168  ;;  %s181_s21 = sand.u32 1, %s571_s17   ;;  %s324_s22 = sshll.u32 %s579_s19, 3 }
  0x23   : > { %s323_s24 = sshll.u32 %s181_s21, 3  ;;  %s589_s29 = smov 0  }
  0x24   : > { %s183_s26 = scalar_lea.vmem [#allocation9], %s323_s24 }
  0x25 LB: >> { %s196_s4 = sadd.s32 %s591_s29, %s324_s22  ;;  %s205_s6 = scalar_lea.vmem %s183_s26, %s591_s29 [#allocation9]  ;;  %s591_s29 = sphi %s589_s29, %s193_s29  }
  0x26   : >> { %s197_s5 = sld [smem:[#allocation3 + %s196_s4]]  ;;  %s193_s29 = sadd.s32 1, %s591_s29  }
  0x27   : >> { %p192_p2 = scmp.ge.s32.totalorder %s193_s29, 8 }
  0x28   : > { %v208_v3 = vld [vmem:[#allocation7] sm:$0xff] (%p192_p2)  ;;  %s223_s8 = scalar_lea.hbm (%p192_p2), %s748_s3, %s324_s22  ;;  %s225_s9 = sshll.u32 (%p192_p2), %s183_s26, 4  ;;  %s226_s9 = int_to_ptr.vmem [resolvable:$true] %s225_s9 }
  0x29   : > { %s227_s10 = sshll.u32 (%p192_p2), %s223_s8, 4  ;;  %s212_s11 = scalar_lea.sflag (%p192_p2), [#allocation6], %s181_s21  ;;  %s228_s10 = int_to_ptr.hbm [resolvable:$true] %s227_s10 }
  0x2a   : > { %s509_s12 = sshra.s32 (%p192_p2), %s228_s10, 4  ;;  %s515_s24 = scalar_lea.hbm (%p192_p2), %s748_s3, 16  ;;  %s510_s12 = int_to_ptr.hbm [resolvable:$true] %s509_s12 }
  0x2b   : > { %s511_s13 = scalar_lea.hbm (%p192_p2), %s510_s12, 8  ;;  %p516_p7 = scmp.lt.s32.totalorder (%p192_p2), %s510_s12, %s748_s3 }
  0x2c   : >> { %p198_p0 = scmp.gt.s32.totalorder %s197_s5, 0  ;;  %p325_p1 = scmp.lt.s32.totalorder %s197_s5, 63 }
  0x2d   : > { %p512_p3 = scmp.ne.s32.totalorder (%p192_p2), %s510_s12, %s511_s13  ;;  %p517_p9 = scmp.lt.s32.totalorder (%p192_p2), %s515_s24, %s511_s13 }
  0x2e   : >> { %s761_s5 = smov (!%p198_p0, %s197_s5), 0 }
  0x2f   : >> { %s763_s5 = smov (!%p325_p1, %s761_s5), 63  ;;  %p513_p5 = pnand (%p192_p2), %p512_p3, %p661_p4 }
  0x30   : >> { %s202_s30 = scalar_lea.vmem [#allocation4], %s763_s5  ;;  %195 = sbr.rel (!%p192_p2) target bundleno = 37 (0x25), region = 79 }
  0x31   : >> { %v203_v0 = vld [vmem:[%s202_s30] sm:$0x1]  ;;  %p514_p6 = pneg (%p192_p2), %p513_p5  ;;  %p518_p10 = por (%p192_p2), %p517_p9, %p516_p7 }
  0x32   : >> { %v204_v1 = vmul.f32 11.313708, %v203_v0 }
  0x33   : > { %p519_p11 = pnand (%p192_p2), %p518_p10, %p514_p6 }
  0x34   : >> { %206 = vst [vmem:[%s205_s6] sm:$0x1] %v204_v1 }
  0x3b   : > { %v207_v2 = vld [vmem:[%s183_s26] sm:$0xff] }
  0x3c   : > { %v209_v4 = vadd.f32 %v208_v3, %v207_v2 }
  0x3e   : > { %210 = vst [vmem:[%s183_s26] sm:$0xff] %v209_v4 }
  0x3f   : > { %522 = shalt.err (!%p519_p11)
}
  0x40   : > { %344 = dma.vmem_to_hbm [thread:$0]  (%p661_p4), %s226_s9, 128, %s228_s10, %s212_s11  }
  0x41 PF: > { %p361_p12 = scmp.ge.s32.totalorder %s587_s0, 2  ;;  %s239_s21 = sand.u32 1, %s567_s16  }
  0x42   : > { %s240_s26 = scalar_lea.sflag [#allocation6], %s239_s21 }
  0x43   : > { %p354_p13 = pnand %p361_p12, %p668_p8 }
  0x45   : > { %p355_p0 = pneg %p354_p13 }
  0x47   : > { %562 = dma.done.wait (%p355_p0), %s240_s26, 128  }
  0x48   : > { %564 = vsyncadd (%p355_p0), %s240_s26, 4294967168  ;;  %s26_s0 = sadd.s32 1, %s587_s0   ;;  %s753_s16 = smov %s571_s17 }
  0x49   : > { %p23_p1 = scmp.ge.s32.totalorder %s26_s0, 4   ;;  %s754_s17 = smov %s575_s18 }
  0x4a   : > { %s755_s18 = smov %s674_s28  ;;  %s756_s19 = smov %s583_s20 }
  0x4b   : > { %s757_s20 = smov %s759_s23  ;;  %25 = sbr.rel (!%p23_p1) target bundleno = 12 (0xc), region = 90 }
  0x50   :  { %246 = vsyncpa [#allocation5], 1 }
  0x51   :  { %248 = vsyncpa [#allocation5 + $0x1], 1 }
  0x52   :  { %249 = vsyncpa [#allocation8], 1 }
  0x53   :  { %250 = vsyncpa [#allocation6], 1 }
  0x54   :  { %252 = vsyncpa [#allocation6 + $0x1], 1 }

</bundles_post_ra>
